<compile_context>
chip_gen: v5e
topology: v5e:2x2
jax: 0.10.0
libtpu: 0.0.40
codegen_flags: <defaults>
</compile_context>

<pallas_src>
import math

import jax
import jax.numpy as jnp
from jax.experimental import pallas as pl
from jax.experimental.pallas import tpu as pltpu


_SQRT1_2 = 0.7071067811865476


def _erf(v):
    # Abramowitz & Stegun 7.1.26 rational approximation, max abs err 1.5e-7.
    a1, a2, a3, a4, a5 = (0.254829592, -0.284496736, 1.421413741,
                          -1.453152027, 1.061405429)
    p = 0.3275911
    a = jnp.abs(v)
    t = 1.0 / (1.0 + p * a)
    poly = ((((a5 * t + a4) * t + a3) * t + a2) * t + a1) * t
    y = 1.0 - poly * jnp.exp(-a * a)
    return jnp.where(v >= 0.0, y, -y)


def _gelu(v):
    # exact GELU (matches torch.nn.GELU() default) via erf
    return 0.5 * v * (1.0 + _erf(v * _SQRT1_2))


def _silu(v):
    return v * jax.nn.sigmoid(v)


def _layernorm(v, gamma, beta, eps=1e-5):
    mu = jnp.mean(v, axis=-1, keepdims=True)
    c = v - mu
    var = jnp.mean(c * c, axis=-1, keepdims=True)
    return c * jax.lax.rsqrt(var + eps) * gamma + beta


def _ffn_kernel(x_ref, ss_ref, w1_ref, b1_ref, w2_ref, vec_ref, wo_ref, o_ref):
    x = x_ref[...]                       # (R, D) rows = Bb batch elems x T steps
    D = x.shape[-1]

    # packed per-feature vectors: rows = [b2, ln_gamma, ln_beta, bo]
    b2 = vec_ref[0:1, :]
    gs = vec_ref[1:2, :]
    bs = vec_ref[2:3, :]
    bo = vec_ref[3:4, :]

    # linear1 -> GELU (dropout identity at inference)
    h = jnp.dot(x, w1_ref[...], preferred_element_type=jnp.float32) + b1_ref[...]
    h = _gelu(h)

    # linear2 (zero_module() in PyTorch init; synthetic nonzero weights here)
    y = jnp.dot(h, w2_ref[...], preferred_element_type=jnp.float32) + b2

    # StylizationBlock: LayerNorm -> *(1+scale)+shift -> SiLU -> Linear, + residual
    yn = _layernorm(y, gs, bs)
    hh = yn * ss_ref[:, :D] + ss_ref[:, D:]          # (1+scale), shift packed lane-wise
    out = jnp.dot(_silu(hh), wo_ref[...], preferred_element_type=jnp.float32) + bo

    o_ref[...] = (x + out).astype(o_ref.dtype)


def ffn_forward(x, emb, params, *, batch_block=2):
    B, T, D = x.shape
    F = params["w1"].shape[1]
    Bb = batch_block
    assert B % Bb == 0, "batch_block must divide batch"
    R = Bb * T                                   # rows per grid step
    assert R % 8 == 0, "rows per block must be sublane-aligned"
    grid = (B // Bb,)

    # StylizationBlock emb projection once, in XLA (degenerate M=1 GEMM if done
    # inside every grid step).  Pack (1+scale, shift) per row, lane-dense.
    e = jax.nn.silu(emb) @ params["we"] + params["be"]        # (B, 2D)
    ss = jnp.concatenate([1.0 + e[:, :D], e[:, D:]], axis=-1)  # (B, 2D)
    ss_rows = jnp.repeat(ss, T, axis=0)                        # (B*T, 2D)

    x_rows = x.reshape(B * T, D)

    # pack small vectors into one lane-dense (4, D) array
    vec = jnp.stack(
        [params["b2"], params["gs"], params["bs"], params["bo"]], axis=0)
    b1 = params["b1"].reshape(1, F)

    out = pl.pallas_call(
        _ffn_kernel,
        out_shape=jax.ShapeDtypeStruct((B * T, D), x.dtype),
        grid_spec=pltpu.PrefetchScalarGridSpec(
            num_scalar_prefetch=0,
            grid=grid,
            in_specs=[
                pl.BlockSpec((R, D), lambda i: (i, 0)),        # x rows
                pl.BlockSpec((R, 2 * D), lambda i: (i, 0)),    # (1+scale, shift) rows
                pl.BlockSpec((D, F), lambda i: (0, 0)),        # w1
                pl.BlockSpec((1, F), lambda i: (0, 0)),        # b1
                pl.BlockSpec((F, D), lambda i: (0, 0)),        # w2
                pl.BlockSpec((4, D), lambda i: (0, 0)),        # [b2, gs, bs, bo]
                pl.BlockSpec((D, D), lambda i: (0, 0)),        # wo
            ],
            out_specs=pl.BlockSpec((R, D), lambda i: (i, 0)),
        ),
        compiler_params=pltpu.CompilerParams(
            dimension_semantics=("parallel",)),
    )(x_rows, ss_rows, params["w1"], b1, params["w2"], vec, params["wo"])
    return out.reshape(B, T, D)


def init_params(key, D, F, E):
    ks = jax.random.split(key, 8)

    def rnd(k, shape, scale=0.1):
        return scale * jax.random.normal(k, shape, dtype=jnp.float32)

    return {
        # linear1: Linear(latent_dim, ffn_dim), weight stored (in, out)
        "w1": rnd(ks[0], (D, F)),
        "b1": rnd(ks[1], (F,), 0.02),
        # linear2: Linear(ffn_dim, latent_dim). NOTE: zero_module() zeroes it in
        # PyTorch; nonzero synthetic values here so the full path is exercised.
        "w2": rnd(ks[2], (F, D), 0.05),
        "b2": rnd(ks[3], (D,), 0.02),
        # StylizationBlock.emb_layers Linear(time_embed_dim, 2*latent_dim)
        "we": rnd(ks[4], (E, 2 * D)),
        "be": rnd(ks[5], (2 * D,), 0.02),
        # StylizationBlock.norm
        "gs": jnp.ones((D,), jnp.float32),
        "bs": jnp.zeros((D,), jnp.float32),
        # StylizationBlock.out_layers Linear(latent_dim, latent_dim) (also
        # zero_module()'d in PyTorch; synthetic nonzero here)
        "wo": rnd(ks[6], (D, D), 0.05),
        "bo": rnd(ks[7], (D,), 0.02),
    }


def reference(x, emb, params):
    """Pure-JAX mirror of the PyTorch FFN forward (eval mode)."""
    p = params

    def ln(v, g, b):
        mu = v.mean(-1, keepdims=True)
        var = ((v - mu) ** 2).mean(-1, keepdims=True)
        return (v - mu) / jnp.sqrt(var + 1e-5) * g + b

    D = x.shape[-1]
    h = jax.nn.gelu(x @ p["w1"] + p["b1"], approximate=False)
    y = h @ p["w2"] + p["b2"]
    e = jax.nn.silu(emb) @ p["we"] + p["be"]          # (B, 2D)
    scale = e[:, None, :D]
    shift = e[:, None, D:]
    hh = ln(y, p["gs"], p["bs"]) * (1.0 + scale) + shift
    out = jax.nn.silu(hh) @ p["wo"] + p["bo"]
    return x + out


if __name__ == "__main__":
    B, T, D = 4, 8, 32        # batch, motion length, latent_dim
    F = 64                    # ffn_dim
    E = 16                    # time_embed_dim

    key = jax.random.PRNGKey(0)
    kx, ke, kp = jax.random.split(key, 3)
    x = jax.random.normal(kx, (B, T, D), jnp.float32)
    emb = jax.random.normal(ke, (B, E), jnp.float32)
    params = init_params(kp, D, F, E)

    out = ffn_forward(x, emb, params, batch_block=2)   # grid=(2,), 2 batches/step
    out = jax.block_until_ready(out)

    ref = reference(x, emb, params)
    assert out.shape == (B, T, D)
    max_err = float(jnp.max(jnp.abs(out - ref)))
    if not jnp.allclose(out, ref, atol=1e-3, rtol=1e-3):
        raise AssertionError(f"mismatch vs reference, max_err={max_err}")
    print("KERNEL_OK")
</pallas_src>

<mosaic_0001>
module attributes {stable_mosaic.version = 11 : i64} {
  func.func @_ffn_kernel(%arg0: i32, %arg1: memref<16x32xf32, #tpu.memory_space<vmem>>, %arg2: memref<16x64xf32, #tpu.memory_space<vmem>>, %arg3: memref<32x64xf32, #tpu.memory_space<vmem>>, %arg4: memref<1x64xf32, #tpu.memory_space<vmem>>, %arg5: memref<64x32xf32, #tpu.memory_space<vmem>>, %arg6: memref<4x32xf32, #tpu.memory_space<vmem>>, %arg7: memref<32x32xf32, #tpu.memory_space<vmem>>, %arg8: memref<16x32xf32, #tpu.memory_space<vmem>>) attributes {dimension_semantics = [#tpu.dimension_semantics<parallel>], iteration_bounds = array<i64: 2>, scalar_prefetch = 0 : i64, scratch_operands = 0 : i64, tpu.core_type = #tpu.core_type<tc>, window_params = [{transform_indices = @transform_0, window_bounds = array<i64: 16, 32>}, {transform_indices = @transform_1, window_bounds = array<i64: 16, 64>}, {pipeline_mode = #tpu.pipeline_mode<synchronous>, transform_indices = @transform_2, window_bounds = array<i64: 32, 64>}, {pipeline_mode = #tpu.pipeline_mode<synchronous>, transform_indices = @transform_3, window_bounds = array<i64: 1, 64>}, {pipeline_mode = #tpu.pipeline_mode<synchronous>, transform_indices = @transform_4, window_bounds = array<i64: 64, 32>}, {pipeline_mode = #tpu.pipeline_mode<synchronous>, transform_indices = @transform_5, window_bounds = array<i64: 4, 32>}, {pipeline_mode = #tpu.pipeline_mode<synchronous>, transform_indices = @transform_6, window_bounds = array<i64: 32, 32>}, {transform_indices = @transform_7, window_bounds = array<i64: 16, 32>}]} {
    %c0 = arith.constant 0 : index
    %c0_0 = arith.constant 0 : index
    %0 = vector.load %arg1[%c0, %c0_0] : memref<16x32xf32, #tpu.memory_space<vmem>>, vector<16x32xf32>
    %c0_1 = arith.constant 0 : index
    %c0_2 = arith.constant 0 : index
    %1 = vector.load %arg6[%c0_1, %c0_2] : memref<4x32xf32, #tpu.memory_space<vmem>>, vector<1x32xf32>
    %c1 = arith.constant 1 : index
    %c0_3 = arith.constant 0 : index
    %2 = vector.load %arg6[%c1, %c0_3] : memref<4x32xf32, #tpu.memory_space<vmem>>, vector<1x32xf32>
    %c2 = arith.constant 2 : index
    %c0_4 = arith.constant 0 : index
    %3 = vector.load %arg6[%c2, %c0_4] : memref<4x32xf32, #tpu.memory_space<vmem>>, vector<1x32xf32>
    %c3 = arith.constant 3 : index
    %c0_5 = arith.constant 0 : index
    %4 = vector.load %arg6[%c3, %c0_5] : memref<4x32xf32, #tpu.memory_space<vmem>>, vector<1x32xf32>
    %c0_6 = arith.constant 0 : index
    %c0_7 = arith.constant 0 : index
    %5 = vector.load %arg3[%c0_6, %c0_7] : memref<32x64xf32, #tpu.memory_space<vmem>>, vector<32x64xf32>
    %cst = arith.constant dense<0.000000e+00> : vector<16x64xf32>
    %6 = tpu.matmul %0, %5, %cst {dimension_numbers = #tpu.dot_dimension_numbers<[1], [0], [0], [1], [0, 0, 1, 1], [], []>} : vector<16x32xf32>, vector<32x64xf32>, vector<16x64xf32> -> vector<16x64xf32>
    %c0_8 = arith.constant 0 : index
    %c0_9 = arith.constant 0 : index
    %7 = vector.load %arg4[%c0_8, %c0_9] : memref<1x64xf32, #tpu.memory_space<vmem>>, vector<1x64xf32>
    %8 = vector.broadcast %7 : vector<1x64xf32> to vector<16x64xf32>
    %9 = arith.addf %6, %8 : vector<16x64xf32>
    %cst_10 = arith.constant 5.000000e-01 : f32
    %10 = vector.broadcast %cst_10 : f32 to vector<16x64xf32>
    %11 = arith.mulf %10, %9 : vector<16x64xf32>
    %cst_11 = arith.constant 0.707106769 : f32
    %12 = vector.broadcast %cst_11 : f32 to vector<16x64xf32>
    %13 = arith.mulf %9, %12 : vector<16x64xf32>
    %14 = math.absf %13 : vector<16x64xf32>
    %cst_12 = arith.constant 0.327591091 : f32
    %15 = vector.broadcast %cst_12 : f32 to vector<16x64xf32>
    %16 = arith.mulf %15, %14 : vector<16x64xf32>
    %cst_13 = arith.constant 1.000000e+00 : f32
    %17 = vector.broadcast %cst_13 : f32 to vector<16x64xf32>
    %18 = arith.addf %17, %16 : vector<16x64xf32>
    %cst_14 = arith.constant 1.000000e+00 : f32
    %19 = vector.broadcast %cst_14 : f32 to vector<16x64xf32>
    %20 = arith.divf %19, %18 : vector<16x64xf32>
    %cst_15 = arith.constant 1.06140542 : f32
    %21 = vector.broadcast %cst_15 : f32 to vector<16x64xf32>
    %22 = arith.mulf %21, %20 : vector<16x64xf32>
    %cst_16 = arith.constant -1.45315206 : f32
    %23 = vector.broadcast %cst_16 : f32 to vector<16x64xf32>
    %24 = arith.addf %22, %23 : vector<16x64xf32>
    %25 = arith.mulf %24, %20 : vector<16x64xf32>
    %cst_17 = arith.constant 1.42141378 : f32
    %26 = vector.broadcast %cst_17 : f32 to vector<16x64xf32>
    %27 = arith.addf %25, %26 : vector<16x64xf32>
    %28 = arith.mulf %27, %20 : vector<16x64xf32>
    %cst_18 = arith.constant -0.284496725 : f32
    %29 = vector.broadcast %cst_18 : f32 to vector<16x64xf32>
    %30 = arith.addf %28, %29 : vector<16x64xf32>
    %31 = arith.mulf %30, %20 : vector<16x64xf32>
    %cst_19 = arith.constant 0.254829586 : f32
    %32 = vector.broadcast %cst_19 : f32 to vector<16x64xf32>
    %33 = arith.addf %31, %32 : vector<16x64xf32>
    %34 = arith.mulf %33, %20 : vector<16x64xf32>
    %cst_20 = arith.constant 0.000000e+00 : f32
    %35 = vector.broadcast %cst_20 : f32 to vector<16x64xf32>
    %36 = arith.subf %35, %14 : vector<16x64xf32>
    %37 = arith.mulf %36, %14 : vector<16x64xf32>
    %38 = math.exp %37 : vector<16x64xf32>
    %39 = arith.mulf %34, %38 : vector<16x64xf32>
    %cst_21 = arith.constant 1.000000e+00 : f32
    %40 = vector.broadcast %cst_21 : f32 to vector<16x64xf32>
    %41 = arith.subf %40, %39 : vector<16x64xf32>
    %cst_22 = arith.constant 0.000000e+00 : f32
    %42 = vector.broadcast %cst_22 : f32 to vector<16x64xf32>
    %43 = arith.cmpf oge, %13, %42 : vector<16x64xf32>
    %cst_23 = arith.constant 0.000000e+00 : f32
    %44 = vector.broadcast %cst_23 : f32 to vector<16x64xf32>
    %45 = arith.subf %44, %41 : vector<16x64xf32>
    %46 = arith.select %43, %41, %45 : vector<16x64xi1>, vector<16x64xf32>
    %cst_24 = arith.constant 1.000000e+00 : f32
    %47 = vector.broadcast %cst_24 : f32 to vector<16x64xf32>
    %48 = arith.addf %47, %46 : vector<16x64xf32>
    %49 = arith.mulf %11, %48 : vector<16x64xf32>
    %c0_25 = arith.constant 0 : index
    %c0_26 = arith.constant 0 : index
    %50 = vector.load %arg5[%c0_25, %c0_26] : memref<64x32xf32, #tpu.memory_space<vmem>>, vector<64x32xf32>
    %cst_27 = arith.constant dense<0.000000e+00> : vector<16x32xf32>
    %51 = tpu.matmul %49, %50, %cst_27 {dimension_numbers = #tpu.dot_dimension_numbers<[1], [0], [0], [1], [0, 0, 1, 1], [], []>} : vector<16x64xf32>, vector<64x32xf32>, vector<16x32xf32> -> vector<16x32xf32>
    %52 = vector.broadcast %1 : vector<1x32xf32> to vector<16x32xf32>
    %53 = arith.addf %51, %52 : vector<16x32xf32>
    %cst_28 = arith.constant dense<0.000000e+00> : vector<16xf32>
    %54 = vector.multi_reduction <add>, %53, %cst_28 [1] : vector<16x32xf32> to vector<16xf32>
    %55 = vector.shape_cast %54 : vector<16xf32> to vector<16x1xf32>
    %cst_29 = arith.constant 3.200000e+01 : f32
    %56 = vector.broadcast %cst_29 : f32 to vector<16x1xf32>
    %57 = arith.divf %55, %56 : vector<16x1xf32>
    %58 = vector.broadcast %57 : vector<16x1xf32> to vector<16x32xf32>
    %59 = arith.subf %53, %58 : vector<16x32xf32>
    %60 = arith.mulf %59, %59 : vector<16x32xf32>
    %cst_30 = arith.constant dense<0.000000e+00> : vector<16xf32>
    %61 = vector.multi_reduction <add>, %60, %cst_30 [1] : vector<16x32xf32> to vector<16xf32>
    %62 = vector.shape_cast %61 : vector<16xf32> to vector<16x1xf32>
    %cst_31 = arith.constant 3.200000e+01 : f32
    %63 = vector.broadcast %cst_31 : f32 to vector<16x1xf32>
    %64 = arith.divf %62, %63 : vector<16x1xf32>
    %cst_32 = arith.constant 9.99999974E-6 : f32
    %65 = vector.broadcast %cst_32 : f32 to vector<16x1xf32>
    %66 = arith.addf %64, %65 : vector<16x1xf32>
    %67 = math.rsqrt %66 : vector<16x1xf32>
    %68 = vector.broadcast %67 : vector<16x1xf32> to vector<16x32xf32>
    %69 = arith.mulf %59, %68 : vector<16x32xf32>
    %70 = vector.broadcast %2 : vector<1x32xf32> to vector<16x32xf32>
    %71 = arith.mulf %69, %70 : vector<16x32xf32>
    %72 = vector.broadcast %3 : vector<1x32xf32> to vector<16x32xf32>
    %73 = arith.addf %71, %72 : vector<16x32xf32>
    %c0_33 = arith.constant 0 : index
    %c0_34 = arith.constant 0 : index
    %74 = vector.load %arg2[%c0_33, %c0_34] : memref<16x64xf32, #tpu.memory_space<vmem>>, vector<16x32xf32>
    %75 = arith.mulf %73, %74 : vector<16x32xf32>
    %c0_35 = arith.constant 0 : index
    %c32 = arith.constant 32 : index
    %76 = vector.load %arg2[%c0_35, %c32] : memref<16x64xf32, #tpu.memory_space<vmem>>, vector<16x32xf32>
    %77 = arith.addf %75, %76 : vector<16x32xf32>
    %78 = arith.negf %77 : vector<16x32xf32>
    %79 = math.exp %78 : vector<16x32xf32>
    %cst_36 = arith.constant 1.000000e+00 : f32
    %80 = vector.broadcast %cst_36 : f32 to vector<16x32xf32>
    %81 = arith.addf %80, %79 : vector<16x32xf32>
    %82 = arith.divf %80, %81 : vector<16x32xf32>
    %83 = arith.mulf %77, %82 : vector<16x32xf32>
    %c0_37 = arith.constant 0 : index
    %c0_38 = arith.constant 0 : index
    %84 = vector.load %arg7[%c0_37, %c0_38] : memref<32x32xf32, #tpu.memory_space<vmem>>, vector<32x32xf32>
    %cst_39 = arith.constant dense<0.000000e+00> : vector<16x32xf32>
    %85 = tpu.matmul %83, %84, %cst_39 {dimension_numbers = #tpu.dot_dimension_numbers<[1], [0], [0], [1], [0, 0, 1, 1], [], []>} : vector<16x32xf32>, vector<32x32xf32>, vector<16x32xf32> -> vector<16x32xf32>
    %86 = vector.broadcast %4 : vector<1x32xf32> to vector<16x32xf32>
    %87 = arith.addf %85, %86 : vector<16x32xf32>
    %88 = arith.addf %0, %87 : vector<16x32xf32>
    %c0_40 = arith.constant 0 : index
    %c0_41 = arith.constant 0 : index
    %89 = vector.load %arg8[%c0_40, %c0_41] : memref<16x32xf32, #tpu.memory_space<vmem>>, vector<16x32xf32>
    tpu.vector_store %arg8[%c0_40, %c0_41], %88 {strides = array<i32>} : memref<16x32xf32, #tpu.memory_space<vmem>>, vector<16x32xf32>,
    return
  }
  func.func @transform_0(%arg0: i32) -> (i32, i32) {
    %c0_i32 = arith.constant 0 : i32
    %c0_i32_0 = arith.constant 0 : i32
    return %arg0, %c0_i32 : i32, i32
  }
  func.func @transform_1(%arg0: i32) -> (i32, i32) {
    %c0_i32 = arith.constant 0 : i32
    %c0_i32_0 = arith.constant 0 : i32
    return %arg0, %c0_i32 : i32, i32
  }
  func.func @transform_2(%arg0: i32) -> (i32, i32) {
    %c0_i32 = arith.constant 0 : i32
    %c0_i32_0 = arith.constant 0 : i32
    %c0_i32_1 = arith.constant 0 : i32
    return %c0_i32, %c0_i32_0 : i32, i32
  }
  func.func @transform_3(%arg0: i32) -> (i32, i32) {
    %c0_i32 = arith.constant 0 : i32
    %c0_i32_0 = arith.constant 0 : i32
    %c0_i32_1 = arith.constant 0 : i32
    return %c0_i32, %c0_i32_0 : i32, i32
  }
  func.func @transform_4(%arg0: i32) -> (i32, i32) {
    %c0_i32 = arith.constant 0 : i32
    %c0_i32_0 = arith.constant 0 : i32
    %c0_i32_1 = arith.constant 0 : i32
    return %c0_i32, %c0_i32_0 : i32, i32
  }
  func.func @transform_5(%arg0: i32) -> (i32, i32) {
    %c0_i32 = arith.constant 0 : i32
    %c0_i32_0 = arith.constant 0 : i32
    %c0_i32_1 = arith.constant 0 : i32
    return %c0_i32, %c0_i32_0 : i32, i32
  }
  func.func @transform_6(%arg0: i32) -> (i32, i32) {
    %c0_i32 = arith.constant 0 : i32
    %c0_i32_0 = arith.constant 0 : i32
    %c0_i32_1 = arith.constant 0 : i32
    return %c0_i32, %c0_i32_0 : i32, i32
  }
  func.func @transform_7(%arg0: i32) -> (i32, i32) {
    %c0_i32 = arith.constant 0 : i32
    %c0_i32_0 = arith.constant 0 : i32
    return %arg0, %c0_i32 : i32, i32
  }
}

</mosaic_0001>

<bundles_post_ra>
// kernel: tpu_custom_call.1
= control target key start
LH: loop header
LB: loop body
LE: loop exit
PB: predicated region body
PF: predicated region fallthrough
CT: control target
= control target key end

     0   :  { %12 = vsyncpa [#allocation3], 0  ;;  %s1262_s0 = inlined_call_operand.vmem [shape: f32[32,32], index: 0, kind: input, shape index: {}]   ;;  %s1263_s1 = inlined_call_operand.vmem [shape: f32[32,64], index: 1, kind: input, shape index: {}]   ;;  %s1264_s2 = inlined_call_operand.vmem [shape: f32[32,64], index: 2, kind: input, shape index: {}]   ;;  %s1265_s3 = inlined_call_operand.vmem [shape: f32[1,64], index: 3, kind: input, shape index: {}]   ;;  %s1266_s4 = inlined_call_operand.vmem [shape: f32[64,32], index: 4, kind: input, shape index: {}]   ;;  %s1267_s5 = inlined_call_operand.hbm [shape: f32[4,32], index: 5, kind: input, shape index: {}]   ;;  %s1268_s6 = inlined_call_operand.hbm [shape: f32[32,32], index: 6, kind: input, shape index: {}]   ;;  %s1269_s7 = inlined_call_operand.hbm [shape: f32[32,32], index: 7, kind: output, shape index: {}]  }
   0x1   :  { %13 = vsyncpa [#allocation6], 0 }
   0x2   :  { %14 = vsyncpa [#allocation4], 0 }
   0x3   :  { %16 = vsyncpa [#allocation4 + $0x1], 0  ;;  %s1066_s24 = smov 0   ;;  %s1068_s25 = smov 0  }
   0x4   :  { %s1070_s26 = smov 0   ;;  %s1072_s27 = smov 0  }
   0x5 LB: > { %s1087_s28 = sadd.s32 4294967295, %s1016_s27   ;;  %s758_s29 = sadd.s32 4294967294, %s1016_s27   ;;  %s1016_s27 = sphi %s1072_s27, %s1276_s27   ;;  %s1012_s26 = sphi %s1070_s26, %s1275_s26   ;;  %s1008_s25 = sphi %s1068_s25, %s1274_s25   ;;  %s1004_s24 = sphi %s1066_s24, %s1273_s24  }
   0x6   : > { %s1091_s30 = sadd.s32 1, %s1016_s27   ;;  %s186_s8 = sadd.s32 1, %s1012_s26 }
   0x7   : > { %s183_s9 = ssub.s32 %s1016_s27, %s1091_s30  ;;  %p196_p0 = scmp.ne.s32.totalorder %s1012_s26, %s1008_s25 }
   0x8   : > { %p184_p1 = scmp.eq.s32.totalorder %s183_s9, 0  ;;  %p197_p2 = scmp.eq.s32.totalorder %s1087_s28, 1 }
   0x9   : > { %p202_p3 = scmp.ne.s32.totalorder %s1008_s25, %s1004_s24  ;;  %p203_p4 = scmp.eq.s32.totalorder %s758_s29, 1 }
   0xa   : > { %s1102_s10 = scalar_select %p184_p1, %s1012_s26, %s186_s8  }
   0xb   : > { %p1104_p5 = por %p197_p2, %p196_p0  ;;  %p1108_p6 = por %p203_p4, %p202_p3 }
   0xc   : > { %p759_p7 = scmp.ge.s32.totalorder %s1016_s27, 1  ;;  %p210_p8 = scmp.lt.s32.totalorder %s1016_s27, 3 }
   0xd   : > { %p814_p9 = scmp.eq.s32.totalorder %s1087_s28, 0  ;;  %s231_s16 = sshll.u32 %s1267_s5, 4  ;;  %s232_s16 = int_to_ptr.hbm [resolvable:$true] %s231_s16 }
   0xe   : > { %p1115_p10 = pnand %p759_p7, %p210_p8  ;;  %s1018_s17 = smov [#allocation2]  }
   0xf   : > { %s233_s18 = sshll.u32 %s1018_s17, 4  ;;  %s242_s21 = sshll.u32 %s1268_s6, 4  ;;  %s234_s18 = int_to_ptr.vmem [resolvable:$true] %s233_s18  ;;  %s243_s21 = int_to_ptr.hbm [resolvable:$true] %s242_s21 }
  0x10   : > { %p803_p11 = pneg %p1115_p10  ;;  %s1019_s22 = smov [#allocation5]  }
  0x11   : > { %s244_s23 = sshll.u32 %s1019_s22, 4  ;;  %s1020_s29 = smov 128   ;;  %s245_s23 = int_to_ptr.vmem [resolvable:$true] %s244_s23 }
  0x12   : > { %p804_p12 = pnand %p814_p9, %p803_p11  ;;  %s1021_s8 = smov 8  }
  0x13   : > { %278 = sbr.rel (%p1115_p10) target bundleno = 801 (0x321), region = 48 }
  0x14   : > { %806 = dma.hbm_to_vmem [thread:$0]  (!%p804_p12), %s232_s16, 64, %s234_s18, [#allocation3]  }
  0x15   : > { %809 = dma.hbm_to_vmem [thread:$0]  (!%p804_p12), %s243_s21, 512, %s245_s23, [#allocation6], %s1020_s29, %s1020_s29, %s1021_s8  }
  0x18   : > { %991 = dma.done.wait (%p814_p9), [#allocation3], 64  }
  0x19   : > { %993 = vsyncadd (%p814_p9), [#allocation3], 4294967232 }
  0x1a   : > { %995 = dma.done.wait (%p814_p9), [#allocation6], 512  }
  0x1b   : > { %997 = vsyncadd (%p814_p9), [#allocation6], 4294966784  ;;  %s767_s9 = sshll.u32 %s1087_s28, 1  ;;  %v343_v0 = vld [vmem:[%s1264_s2 + $0x18] sm:$0xff]  ;;  %v342_v1 = vld [vmem:[%s1264_s2 + $0x10] sm:$0xff]  ;;  %vm348_vm0 = vcmask 261120  }
  0x1c   : > { %p322_p13 = scmp.lt.s32.totalorder %s767_s9, 3  ;;  %367 = vmatpush.msra.mxu0 %v343_v0  ;;  %v341_v2 = vld [vmem:[%s1264_s2 + $0x8] sm:$0xff]  ;;  %v340_v3 = vld [vmem:[%s1264_s2] sm:$0xff]  ;;  %v465_v7 = vld [vmem:[%s1266_s4 + $0x38] sm:$0xff]  ;;  %vm467_vm10 = vcmask 523264   ;;  %s784_s29 = sshll.u32 %s1087_s28, 4 }
  0x1d   : > { %v859_v6 = vld [vmem:[%s1265_s3] ss:$0 sm:$0xff]  ;;  %v464_v8 = vld [vmem:[%s1266_s4 + $0x30] sm:$0xff]  ;;  %482 = vmatpush.msra.mxu1 %v465_v7  ;;  %785 = vmatpush.msra.mxu3 %v465_v7  ;;  %v463_v11 = vld [vmem:[%s1266_s4 + $0x28] sm:$0xff]  ;;  %s658_s15 = scalar_lea.hbm %s1269_s7, %s784_s29 }
  0x1e   : > { %s1278_s9 = smov (!%p322_p13, %s767_s9), 3  ;;  %368 = vmatpush.msra.mxu0 %v342_v1  ;;  %v462_v13 = vld [vmem:[%s1266_s4 + $0x20] sm:$0xff]  ;;  %v461_v15 = vld [vmem:[%s1266_s4 + $0x18] sm:$0xff]  ;;  %v460_v17 = vld [vmem:[%s1266_s4 + $0x10] sm:$0xff]  ;;  %s661_s17 = sshll.u32 %s658_s15, 4  ;;  %s662_s17 = int_to_ptr.hbm [resolvable:$true] %s661_s17 }
  0x1f   : > { %s768_s13 = sshll.u32 %s1278_s9, 3  ;;  %483 = vmatpush.msra.mxu1 %v464_v8  ;;  %786 = vmatpush.msra.mxu3 %v464_v8  ;;  %v459_v21 = vld [vmem:[%s1266_s4 + $0x8] sm:$0xff]  ;;  %v458_v22 = vld [vmem:[%s1266_s4] sm:$0xff]  ;;  %s318_s9 = sand.u32 1, %s1008_s25  }
  0x20   : > { %s325_s22 = scalar_lea.vmem %s1262_s0, %s768_s13  ;;  %369 = vmatpush.msra.mxu0 %v341_v2  ;;  %s331_s21 = scalar_lea.vmem %s1263_s1, %s768_s13 }
  0x21   : > { %v1160_v4 = vld [vmem:[%s325_s22] sm:$0xff]  ;;  %v1164_v5 = vld [vmem:[%s325_s22 + $0x8] sm:$0xff]  ;;  %484 = vmatpush.msra.mxu1 %v463_v11  ;;  %787 = vmatpush.msra.mxu3 %v463_v11  ;;  %s1023_s22 = smov 96   ;;  %s766_s13 = sshll.u32 %s318_s9, 4 }
  0x22   : > { %370 = vmatpush.msra.mxu0 %v340_v3  ;;  %s320_s23 = scalar_lea.vmem [#allocation7], %s766_s13  ;;  %s647_s18 = scalar_lea.sflag [#allocation4], %s318_s9 }
  0x23   : > { %771 = vmatmul.msk.f32.vlgmr.msra.gmra.mxu0 %vm348_vm0, %v1160_v4  ;;  %485 = vmatpush.msra.mxu1 %v462_v13  ;;  %s659_s16 = sshll.u32 %s320_s23, 4  ;;  %s960_s19 = sshra.s32 %s662_s17, 4  ;;  %s660_s16 = int_to_ptr.vmem [resolvable:$true] %s659_s16  ;;  %s961_s19 = int_to_ptr.hbm [resolvable:$true] %s960_s19 }
  0x24   : > { %788 = vmatpush.msra.mxu3 %v462_v13  ;;  %s962_s20 = scalar_lea.hbm %s961_s19, 16  ;;  %p967_p3 = scmp.lt.s32.totalorder %s961_s19, %s1269_s7 }
  0x25   : > { %486 = vmatpush.msra.mxu1 %v461_v15  ;;  %p963_p0 = scmp.ne.s32.totalorder %s961_s19, %s962_s20 }
  0x26   : > { %789 = vmatpush.msra.mxu3 %v461_v15 }
  0x27   : > { %487 = vmatpush.msra.mxu1 %v460_v17  ;;  %p964_p1 = pnand %p963_p0, %p1104_p5 }
  0x28   : > { %790 = vmatpush.msra.mxu3 %v460_v17 }
  0x29   : > { %488 = vmatpush.msra.mxu1 %v459_v21  ;;  %p965_p2 = pneg %p964_p1 }
  0x2a   : > { %791 = vmatpush.msra.mxu3 %v459_v21 }
  0x2b   : > { %772 = vmatmul.msk.f32.gmra.mxu0 %vm348_vm0, %v1164_v5  ;;  %489 = vmatpush.msra.mxu1 %v458_v22 }
  0x2c   : > { %792 = vmatpush.msra.mxu3 %v458_v22 }
  0xa0   : > { %v372_v9 = vpop.f32.mrf.mxu0 }
  0xa1   : > { %v1177_v10 = vadd.f32 %v859_v6, %v372_v9 }
  0xa3   : > { %v1183_v12 = vmul.f32 0.70710677, %v1177_v10  ;;  %v378_v15 = vmul.f32 0.5, %v1177_v10 }
  0xa5   : > { %v382_v14 = vand.u32 2147483647, %v1183_v12  ;;  %vm448_vm9 = vcmp.ge.f32.partialorder %v1183_v12, 0.0 }
  0xa7   : > { %v384_v16 = vmul.f32 0.3275911, %v382_v14  ;;  %v436_v37 = vsub.f32 0.0, %v382_v14 }
  0xa8   : > { %v375_v18 = vpop.f32.mrf.mxu0 }
  0xa9   : > { %v386_v19 = vadd.f32 1.0, %v384_v16  ;;  %v1195_v20 = vadd.f32 %v859_v6, %v375_v18  ;;  %v438_v44 = vmul.f32 %v436_v37, %v382_v14  ;;  %v554_v37 = vld [vmem:[%s331_s21] sm:$0xff] }
  0xaa   : > { %560 = vrot.lane.b32.xlu2 %v554_v37, %s1023_s22 }
  0xab   : > { %864 = vrcp.f32 %v386_v19  ;;  %v1204_v23 = vmul.f32 0.70710677, %v1195_v20  ;;  %v399_v30 = vand.u32 2147483648, %v386_v19  ;;  %v397_v32 = vand.u32 2147483647, %v386_v19 }
  0xac   : > { %vm393_vm2 = vweird.f32 %v386_v19  ;;  %v440_v51 = vmul.f32 1.442695, %v438_v44 }
  0xad   : > { %v383_v24 = vand.u32 2147483647, %v1204_v23  ;;  %v400_v34 = vor.u32 1.1754944e-38, %v399_v30  ;;  %vm398_vm4 = vcmp.eq.f32.partialorder %v397_v32, 8.507059e+37  ;;  %vm449_vm11 = vcmp.ge.f32.partialorder %v1204_v23, 0.0 }
  0xaf   : > { %v385_v25 = vmul.f32 0.3275911, %v383_v24  ;;  %v437_v53 = vsub.f32 0.0, %v383_v24 }
  0xb1   : > { %v865_v26 = vpop.eup %864  ;;  %v387_v28 = vadd.f32 1.0, %v385_v25  ;;  %v439_v59 = vmul.f32 %v437_v53, %v383_v24 }
  0xb2   : > { %v389_v27 = vmul.f32 %v865_v26, %v386_v19  ;;  %vm394_vm1 = vweird.f32 %v865_v26 }
  0xb3   : > { %866 = vrcp.f32 %v387_v28  ;;  %vm395_vm3 = vmor %vm393_vm2, %vm394_vm1  ;;  %v414_v42 = vand.u32 2147483648, %v387_v28  ;;  %v412_v46 = vand.u32 2147483647, %v387_v28  ;;  %vm408_vm6 = vweird.f32 %v387_v28 }
  0xb4   : > { %v390_v29 = vsub.f32 1.0, %v389_v27  ;;  %868 = vpow2.f32 %v440_v51  ;;  %v442_v0 = vmul.f32 1.442695, %v439_v59 }
  0xb5   : > { %v415_v49 = vor.u32 1.1754944e-38, %v414_v42  ;;  %vm413_vm8 = vcmp.eq.f32.partialorder %v412_v46, 8.507059e+37 }
  0xb6   : > { %v391_v31 = vmul.f32 %v865_v26, %v390_v29  ;;  %870 = vpow2.f32 %v442_v0 }
  0xb8   : > { %v392_v33 = vadd.f32 %v865_v26, %v391_v31 }
  0xb9   : > { %v867_v35 = vpop.eup %866 }
  0xba   : > { %v396_v36 = vsel %vm395_vm3, %v865_v26, %v392_v33  ;;  %v404_v38 = vmul.f32 %v867_v35, %v387_v28  ;;  %vm409_vm5 = vweird.f32 %v867_v35  ;;  %v869_v2 = vpop.eup %868  ;;  %v379_v26 = vmul.f32 0.5, %v1195_v20  ;;  %v860_v28 = vld [vmem:[#allocation2] ss:$0 sm:$0xff] }
  0xbb   : > { %v401_v39 = vsel %vm398_vm4, %v400_v34, %v396_v36  ;;  %vm410_vm7 = vmor %vm408_vm6, %vm409_vm5  ;;  %v1022_v34 = vmov 32.0  }
  0xbc   : > { %v418_v40 = vmul.f32 1.0614054, %v401_v39  ;;  %v405_v41 = vsub.f32 1.0, %v404_v38  ;;  %v871_v18 = vpop.eup %870  ;;  %872 = vrcp.f32 %v1022_v34 }
  0xbe   : > { %v420_v43 = vadd.f32 -1.4531521, %v418_v40  ;;  %v406_v45 = vmul.f32 %v867_v35, %v405_v41 }
  0xc0   : > { %v422_v47 = vmul.f32 %v420_v43, %v401_v39  ;;  %v407_v48 = vadd.f32 %v867_v35, %v406_v45 }
  0xc2   : > { %v424_v50 = vadd.f32 1.4214138, %v422_v47  ;;  %v411_v52 = vsel %vm410_vm7, %v867_v35, %v407_v48  ;;  %v873_v23 = vpop.eup %872 }
  0xc3   : > { %v416_v55 = vsel %vm413_vm8, %v415_v49, %v411_v52  ;;  %v504_v35 = vmul.f32 32.0, %v873_v23  ;;  %vm508_vm12 = vweird.f32 %v873_v23 }
  0xc4   : > { %v426_v54 = vmul.f32 %v424_v50, %v401_v39  ;;  %v419_v56 = vmul.f32 1.0614054, %v416_v55 }
  0xc5   : > { %v505_v20 = vsub.f32 1.0, %v504_v35 }
  0xc6   : > { %v428_v57 = vadd.f32 -0.28449672, %v426_v54  ;;  %v421_v58 = vadd.f32 -1.4531521, %v419_v56 }
  0xc7   : > { %v506_v36 = vmul.f32 %v873_v23, %v505_v20 }
  0xc8   : > { %v430_v60 = vmul.f32 %v428_v57, %v401_v39  ;;  %v423_v61 = vmul.f32 %v421_v58, %v416_v55 }
  0xc9   : > { %v507_v38 = vadd.f32 %v873_v23, %v506_v36 }
  0xca   : > { %v432_v62 = vadd.f32 0.2548296, %v430_v60  ;;  %v425_v63 = vadd.f32 1.4214138, %v423_v61 }
  0xcb   : > { %v509_v40 = vsel %vm508_vm12, %v873_v23, %v507_v38 }
  0xcc   : > { %v434_v1 = vmul.f32 %v432_v62, %v401_v39  ;;  %v427_v3 = vmul.f32 %v425_v63, %v416_v55  ;;  %v1218_v39 = vld [vmem:[%s331_s21 + $0x8] sm:$0xff]  ;;  %v861_v63 = vld [vmem:[#allocation2 + $0x1] ss:$0 sm:$0xff] }
  0xcd   : > { %562 = vrot.lane.b32.xlu2 %v1218_v39, %s1023_s22  ;;  %s966_s22 = scalar_lea.hbm %s1269_s7, 32 }
  0xce   : > { %v444_v6 = vmul.f32 %v869_v2, %v434_v1  ;;  %v429_v7 = vadd.f32 -0.28449672, %v427_v3  ;;  %v862_v2 = vld [vmem:[#allocation2 + $0x2] ss:$0 sm:$0xff]  ;;  %p968_p4 = scmp.lt.s32.totalorder %s966_s22, %s962_s20 }
  0xd0   : > { %v446_v8 = vsub.f32 1.0, %v444_v6  ;;  %v431_v9 = vmul.f32 %v429_v7, %v416_v55  ;;  %v611_v7 = vld [vmem:[#allocation5 + $0x18] sm:$0xff]  ;;  %p969_p7 = por %p968_p4, %p967_p3 }
  0xd1   : > { %631 = vmatpush.msra.mxu2 %v611_v7 }
  0xd2   : > { %v450_v11 = vsub.f32 0.0, %v446_v8  ;;  %v433_v13 = vadd.f32 0.2548296, %v431_v9  ;;  %p970_p8 = pnand %p969_p7, %p965_p2 }
  0xd4   : > { %v452_v14 = vsel %vm448_vm9, %v446_v8, %v450_v11  ;;  %v435_v17 = vmul.f32 %v433_v13, %v416_v55  ;;  %v610_v13 = vld [vmem:[#allocation5 + $0x10] sm:$0xff] }
  0xd5   : > { %v454_v16 = vadd.f32 1.0, %v452_v14  ;;  %632 = vmatpush.msra.mxu2 %v610_v13 }
  0xd6   : > { %v445_v21 = vmul.f32 %v871_v18, %v435_v17 }
  0xd7   : > { %v456_v19 = vmul.f32 %v454_v16, %v378_v15  ;;  %v609_v16 = vld [vmem:[#allocation5 + $0x8] sm:$0xff] }
  0xd8   : > { %v447_v22 = vsub.f32 1.0, %v445_v21  ;;  %633 = vmatpush.msra.mxu2 %v609_v16 }
  0xd9   : > { %773 = vmatmul.msk.f32.vlgmr.msra.gmra.mxu1 %vm467_vm10, %v456_v19  ;;  %v608_v19 = vld [vmem:[#allocation5] sm:$0xff] }
  0xda   : > { %v451_v24 = vsub.f32 0.0, %v447_v22  ;;  %634 = vmatpush.msra.mxu2 %v608_v19 }
  0xdc   : > { %v453_v25 = vsel %vm449_vm11, %v447_v22, %v451_v24 }
  0xdd   : > { %v455_v27 = vadd.f32 1.0, %v453_v25 }
  0xdf   : > { %v457_v12 = vmul.f32 %v455_v27, %v379_v26 }
  0xe1   : > { %774 = vmatmul.msk.f32.vlgmr.msra.gmra.mxu3 %vm467_vm10, %v457_v12 }
 0x104   : > { %v561_v11 = vpop.permute.xlu2 %560 }
 0x156   : > { %v491_v10 = vpop.f32.mrf.mxu1 }
 0x157   : > { %v492_v29 = vadd.f32 %v860_v28, %v491_v10 }
 0x159   : > { %v497_v30 = vsel %vm348_vm0, %v492_v29, 0.0 }
 0x15a   : > { %498 = vadd.xlane.f32.xlu0 %v497_v30 }
 0x164   : > { %v494_v31 = vpop.f32.mrf.mxu3 }
 0x165   : > { %v495_v32 = vadd.f32 %v860_v28, %v494_v31 }
 0x167   : > { %v500_v33 = vsel %vm348_vm0, %v495_v32, 0.0 }
 0x168   : > { %501 = vadd.xlane.f32.xlu0 %v500_v33 }
 0x1cd   : > { %v499_v41 = vpop.xlane.xlu0 %498 }
 0x1ce   : > { %v510_v42 = vmul.f32 %v509_v40, %v499_v41 }
 0x1d0   : > { %v512_v43 = vsub.f32 %v492_v29, %v510_v42  ;;  %v563_v29 = vpop.permute.xlu2 %562 }
 0x1d2   : > { %v514_v44 = vmul.f32 %v512_v43, %v512_v43 }
 0x1d4   : > { %v516_v45 = vsel %vm348_vm0, %v514_v44, 0.0 }
 0x1d5   : > { %517 = vadd.xlane.f32.xlu1 %v516_v45 }
 0x1db   : > { %v502_v46 = vpop.xlane.xlu0 %501 }
 0x1dc   : > { %v511_v47 = vmul.f32 %v509_v40, %v502_v46 }
 0x1de   : > { %v513_v48 = vsub.f32 %v495_v32, %v511_v47 }
 0x1e0   : > { %v515_v49 = vmul.f32 %v513_v48, %v513_v48 }
 0x1e2   : > { %v519_v50 = vsel %vm348_vm0, %v515_v49, 0.0 }
 0x1e3   : > { %520 = vadd.xlane.f32.xlu1 %v519_v50 }
 0x248   : > { %v518_v51 = vpop.xlane.xlu1 %517 }
 0x249   : > { %v522_v52 = vmul.f32 %v518_v51, %v509_v40 }
 0x24b   : > { %v524_v53 = vadd.f32 1e-05, %v522_v52 }
 0x24d   : > { %874 = vrsqrt.f32 %v524_v53  ;;  %vm532_vm14 = vweird.f32 %v524_v53 }
 0x253   : > { %v875_v54 = vpop.eup %874 }
 0x254   : > { %v527_v55 = vmul.f32 %v875_v54, %v524_v53  ;;  %vm533_vm13 = vweird.f32 %v875_v54 }
 0x255   : > { %vm534_vm15 = vmor %vm532_vm14, %vm533_vm13 }
 0x256   : > { %v528_v56 = vmul.f32 %v875_v54, %v527_v55  ;;  %v521_v57 = vpop.xlane.xlu1 %520  ;;  %v863_v55 = vld [vmem:[#allocation2 + $0x3] ss:$0 sm:$0xff] }
 0x257   : > { %v523_v59 = vmul.f32 %v521_v57, %v509_v40 }
 0x258   : > { %v529_v58 = vmul.f32 0.5, %v528_v56 }
 0x259   : > { %v525_v61 = vadd.f32 1e-05, %v523_v59 }
 0x25a   : > { %v530_v60 = vsub.f32 1.5, %v529_v58 }
 0x25b   : > { %876 = vrsqrt.f32 %v525_v61  ;;  %vm542_vm2 = vweird.f32 %v525_v61 }
 0x25c   : > { %v531_v62 = vmul.f32 %v875_v54, %v530_v60 }
 0x25e   : > { %v535_v0 = vsel %vm534_vm15, %v875_v54, %v531_v62 }
 0x25f   : > { %v546_v1 = vmul.f32 %v535_v0, %v512_v43 }
 0x261   : > { %v549_v3 = vmul.f32 %v861_v63, %v546_v1  ;;  %v877_v6 = vpop.eup %876 }
 0x262   : > { %v537_v8 = vmul.f32 %v877_v6, %v525_v61  ;;  %vm543_vm1 = vweird.f32 %v877_v6 }
 0x263   : > { %v552_v9 = vadd.f32 %v862_v2, %v549_v3  ;;  %vm544_vm3 = vmor %vm542_vm2, %vm543_vm1 }
 0x264   : > { %v538_v14 = vmul.f32 %v877_v6, %v537_v8 }
 0x265   : > { %v556_v15 = vmul.f32 %v554_v37, %v552_v9 }
 0x266   : > { %v539_v17 = vmul.f32 0.5, %v538_v14 }
 0x267   : > { %v566_v18 = vadd.f32 %v561_v11, %v556_v15 }
 0x268   : > { %v540_v21 = vsub.f32 1.5, %v539_v17 }
 0x269   : > { %v775_v22 = vmul.f32 -1.442695, %v566_v18 }
 0x26a   : > { %v541_v24 = vmul.f32 %v877_v6, %v540_v21 }
 0x26b   : > { %878 = vpow2.f32 %v775_v22 }
 0x26c   : > { %v545_v25 = vsel %vm544_vm3, %v877_v6, %v541_v24 }
 0x26d   : > { %v547_v26 = vmul.f32 %v545_v25, %v513_v48 }
 0x26f   : > { %v550_v27 = vmul.f32 %v861_v63, %v547_v26 }
 0x271   : > { %v879_v12 = vpop.eup %878  ;;  %v553_v10 = vadd.f32 %v862_v2, %v550_v27 }
 0x272   : > { %v574_v28 = vadd.f32 1.0, %v879_v12 }
 0x273   : > { %v557_v30 = vmul.f32 %v1218_v39, %v553_v10 }
 0x274   : > { %880 = vrcp.f32 %v574_v28  ;;  %v587_v35 = vand.u32 2147483648, %v574_v28  ;;  %v585_v36 = vand.u32 2147483647, %v574_v28  ;;  %vm581_vm5 = vweird.f32 %v574_v28 }
 0x275   : > { %v567_v31 = vadd.f32 %v563_v29, %v557_v30 }
 0x276   : > { %v588_v40 = vor.u32 1.1754944e-38, %v587_v35  ;;  %vm586_vm7 = vcmp.eq.f32.partialorder %v585_v36, 8.507059e+37 }
 0x277   : > { %v776_v32 = vmul.f32 -1.442695, %v567_v31 }
 0x279   : > { %882 = vpow2.f32 %v776_v32 }
 0x27a   : > { %v881_v33 = vpop.eup %880 }
 0x27b   : > { %v577_v34 = vmul.f32 %v881_v33, %v574_v28  ;;  %vm582_vm4 = vweird.f32 %v881_v33 }
 0x27c   : > { %vm583_vm6 = vmor %vm581_vm5, %vm582_vm4 }
 0x27d   : > { %v578_v23 = vsub.f32 1.0, %v577_v34 }
 0x27f   : > { %v579_v20 = vmul.f32 %v881_v33, %v578_v23  ;;  %v883_v37 = vpop.eup %882 }
 0x280   : > { %v575_v41 = vadd.f32 1.0, %v883_v37 }
 0x281   : > { %v580_v38 = vadd.f32 %v881_v33, %v579_v20 }
 0x282   : > { %884 = vrcp.f32 %v575_v41  ;;  %v602_v47 = vand.u32 2147483648, %v575_v41  ;;  %v600_v49 = vand.u32 2147483647, %v575_v41  ;;  %vm596_vm9 = vweird.f32 %v575_v41 }
 0x283   : > { %v584_v42 = vsel %vm583_vm6, %v881_v33, %v580_v38 }
 0x284   : > { %v589_v43 = vsel %vm586_vm7, %v588_v40, %v584_v42  ;;  %v603_v51 = vor.u32 1.1754944e-38, %v602_v47  ;;  %vm601_vm11 = vcmp.eq.f32.partialorder %v600_v49, 8.507059e+37 }
 0x285   : > { %v606_v39 = vmul.f32 %v589_v43, %v566_v18 }
 0x287   : > { %777 = vmatmul.msk.f32.vlgmr.msra.gmra.mxu2 %vm348_vm0, %v606_v39 }
 0x288   : > { %v885_v44 = vpop.eup %884 }
 0x289   : > { %v592_v45 = vmul.f32 %v885_v44, %v575_v41  ;;  %vm597_vm8 = vweird.f32 %v885_v44 }
 0x28a   : > { %vm598_vm10 = vmor %vm596_vm9, %vm597_vm8 }
 0x28b   : > { %v593_v46 = vsub.f32 1.0, %v592_v45 }
 0x28d   : > { %v594_v48 = vmul.f32 %v885_v44, %v593_v46 }
 0x28f   : > { %v595_v50 = vadd.f32 %v885_v44, %v594_v48 }
 0x291   : > { %v599_v52 = vsel %vm598_vm10, %v885_v44, %v595_v50 }
 0x292   : > { %v604_v53 = vsel %vm601_vm11, %v603_v51, %v599_v52 }
 0x293   : > { %v607_v54 = vmul.f32 %v604_v53, %v567_v31 }
 0x295   : > { %778 = vmatmul.msk.f32.gmra.mxu2 %vm348_vm0, %v607_v54 }
 0x30a   : > { %v636_v56 = vpop.f32.mrf.mxu2 }
 0x30b   : > { %v637_v57 = vadd.f32 %v863_v55, %v636_v56 }
 0x30d   : > { %v642_v58 = vadd.f32 %v637_v57, %v1160_v4 }
 0x30f   : > { %644 = vst.msk [vmem:[%s320_s23] sm:$0xff] %vm348_vm0, %v642_v58 }
 0x318   : > { %v639_v59 = vpop.f32.mrf.mxu2 }
 0x319   : > { %v640_v60 = vadd.f32 %v863_v55, %v639_v59 }
 0x31b   : > { %v643_v61 = vadd.f32 %v640_v60, %v1164_v5 }
 0x31d   : > { %645 = vst.msk [vmem:[%s320_s23 + $0x8] sm:$0xff] %vm348_vm0, %v643_v61 }
 0x31e   : > { %973 = shalt.err (!%p970_p8)
}
 0x31f   : > { %s1024_s9 = smov 128   ;;  %s1025_s23 = smov 8  }
 0x320   : > { %801 = dma.vmem_to_hbm [thread:$0]  (%p1104_p5), %s660_s16, 256, %s662_s17, %s647_s18, %s1024_s9, %s1024_s9, %s1025_s23  }
 0x321 PF: > { %p818_p9 = scmp.ge.s32.totalorder %s1016_s27, 2  ;;  %s676_s8 = sand.u32 1, %s1004_s24  }
 0x322   : > { %s677_s14 = scalar_lea.sflag [#allocation4], %s676_s8 }
 0x323   : > { %p811_p10 = pnand %p818_p9, %p1108_p6 }
 0x325   : > { %p812_p11 = pneg %p811_p10 }
 0x327   : > { %999 = dma.done.wait (%p812_p11), %s677_s14, 256  }
 0x328   : > { %1001 = vsyncadd (%p812_p11), %s677_s14, 4294967040  ;;  %p19_p12 = scmp.ge.s32.totalorder %s1091_s30, 4   ;;  %s1273_s24 = smov %s1008_s25 }
 0x329   : > { %s1274_s25 = smov %s1012_s26  ;;  %s1275_s26 = smov %s1102_s10 }
 0x32a   : > { %s1276_s27 = smov %s1091_s30  ;;  %21 = sbr.rel (!%p19_p12) target bundleno = 5 (0x5), region = 95 }
 0x32f   :  { %683 = vsyncpa [#allocation3], 1 }
 0x330   :  { %685 = vsyncpa [#allocation3 + $0x1], 1 }
 0x331   :  { %686 = vsyncpa [#allocation6], 1 }
 0x332   :  { %687 = vsyncpa [#allocation4], 1 }
 0x333   :  { %689 = vsyncpa [#allocation4 + $0x1], 1 }

</bundles_post_ra>
